<compile_context>
chip_gen: v6e
topology: v6e:2x2x1
jax: 0.10.0
libtpu: 0.0.40
codegen_flags: <defaults>
</compile_context>

<pallas_src>
import functools
import math

import jax
import jax.numpy as jnp
from jax.experimental import pallas as pl
from jax.experimental.pallas import tpu as pltpu

F32 = jnp.float32
BF16 = jnp.bfloat16
VMEM_LIMIT = 32 * 1024 * 1024


# ============================================================================
# Small helpers
# ============================================================================

def _round_up(x, m):
    return -(-x // m) * m


def _pick_tile(dim, unit, max_tile):
    """Return (padded_dim, tile) with tile % unit == 0 and tile | padded_dim."""
    d = _round_up(dim, unit)
    if d <= max_tile:
        return d, d
    for cand in range(max_tile, unit - 1, -unit):
        if d % cand == 0:
            return d, cand
    d = _round_up(dim, max_tile)
    return d, max_tile


def _pad2(x, rows, cols):
    if x.shape == (rows, cols):
        return x
    return jnp.pad(x, ((0, rows - x.shape[0]), (0, cols - x.shape[1])))


# ============================================================================
# Pallas kernels
# ============================================================================

def _mm_kernel(*refs, relu, has_res, use_scratch):
    """GEMM with bias (+ residual) (+ ReLU) epilogue.

    f32 output: accumulate directly into out_ref (k-invariant output block is
    VMEM resident; no scratch).  bf16 output: accumulate in f32 scratch, cast
    at the last k step.
    """
    if has_res:
        a_ref, b_ref, bias_ref, res_ref, o_ref = refs[:5]
        acc_ref = refs[5] if use_scratch else o_ref
    else:
        a_ref, b_ref, bias_ref, o_ref = refs[:4]
        res_ref = None
        acc_ref = refs[4] if use_scratch else o_ref

    @pl.when(pl.program_id(2) == 0)
    def _():
        acc_ref[...] = jnp.zeros_like(acc_ref)

    acc_ref[...] += jnp.dot(a_ref[...], b_ref[...],
                            preferred_element_type=jnp.float32)

    @pl.when(pl.program_id(2) == pl.num_programs(2) - 1)
    def _():
        y = acc_ref[...] + bias_ref[...]
        if res_ref is not None:
            y = y + res_ref[...].astype(jnp.float32)
        if relu:
            y = jnp.maximum(y, 0.0)
        o_ref[...] = y.astype(o_ref.dtype)


@functools.partial(jax.jit, static_argnames=("relu", "out_dtype"))
def pallas_matmul(a, b, bias=None, residual=None, relu=False, out_dtype=F32):
    """(relu?)(A @ B + bias [+ residual]).  bf16 MXU operands, f32 accumulate,
    epilogue fused into the last-k step; output dtype selectable (bf16 when
    the consumer is another bf16 GEMM)."""
    M, K = a.shape
    K2, N = b.shape
    assert K == K2
    Mp, tm = _pick_tile(M, 16, 512)
    Np, tn = _pick_tile(N, 128, 256)   # 256 cap fits v5e scoped VMEM / v7x
    Kp, tk = _pick_tile(K, 128, 1024)

    a_p = _pad2(a.astype(BF16), Mp, Kp)
    b_p = _pad2(b.astype(BF16), Kp, Np)
    if bias is None:
        bias_p = jnp.zeros((1, Np), F32)
    else:
        bias_p = _pad2(bias.astype(F32).reshape(1, -1), 1, Np)

    in_specs = [
        pl.BlockSpec((tm, tk), lambda i, j, k: (i, k)),
        pl.BlockSpec((tk, tn), lambda i, j, k: (k, j)),
        pl.BlockSpec((1, tn), lambda i, j, k: (0, j)),
    ]
    operands = [a_p, b_p, bias_p]
    has_res = residual is not None
    if has_res:
        in_specs.append(pl.BlockSpec((tm, tn), lambda i, j, k: (i, j)))
        operands.append(_pad2(residual, Mp, Np))

    use_scratch = (out_dtype != F32)
    scratch = [pltpu.VMEM((tm, tn), jnp.float32)] if use_scratch else []
    kernel = functools.partial(_mm_kernel, relu=relu, has_res=has_res,
                               use_scratch=use_scratch)

    flops = 2 * Mp * Np * Kp
    out_bytes = Mp * Np * (2 if out_dtype == BF16 else 4)
    bytes_accessed = 2 * (Mp * Kp + Kp * Np) + out_bytes

    out = pl.pallas_call(
        kernel,
        out_shape=jax.ShapeDtypeStruct((Mp, Np), out_dtype),
        grid=(Mp // tm, Np // tn, Kp // tk),
        in_specs=in_specs,
        out_specs=pl.BlockSpec((tm, tn), lambda i, j, k: (i, j)),
        scratch_shapes=scratch,
        compiler_params=pltpu.CompilerParams(
            dimension_semantics=("parallel", "parallel", "arbitrary"),
            vmem_limit_bytes=VMEM_LIMIT),
        cost_estimate=pl.CostEstimate(flops=flops, transcendentals=0,
                                      bytes_accessed=bytes_accessed),
    )(*operands)
    return out[:M, :N] if (Mp != M or Np != N) else out


def _layernorm_kernel(x_ref, g_ref, b_ref, o_ref):
    x = x_ref[...]
    mu = jnp.mean(x, axis=-1, keepdims=True)
    var = jnp.mean(jnp.square(x - mu), axis=-1, keepdims=True)
    o_ref[...] = (x - mu) * jax.lax.rsqrt(var + 1e-5) * g_ref[...] + b_ref[...]


@jax.jit
def pallas_layernorm(x2d, gamma, beta):
    M, D = x2d.shape
    Mp, tr = _pick_tile(M, 8, 512)
    xp = x2d if Mp == M else jnp.pad(x2d, ((0, Mp - M), (0, 0)))
    out = pl.pallas_call(
        _layernorm_kernel,
        out_shape=jax.ShapeDtypeStruct((Mp, D), F32),
        grid=(Mp // tr,),
        in_specs=[pl.BlockSpec((tr, D), lambda i: (i, 0)),
                  pl.BlockSpec((1, D), lambda i: (0, 0)),
                  pl.BlockSpec((1, D), lambda i: (0, 0))],
        out_specs=pl.BlockSpec((tr, D), lambda i: (i, 0)),
        compiler_params=pltpu.CompilerParams(
            dimension_semantics=("parallel",)),
    )(xp, gamma.reshape(1, -1), beta.reshape(1, -1))
    return out[:M] if Mp != M else out


def _softmax_kernel(x_ref, o_ref):
    x = x_ref[...]
    m = jnp.max(x, axis=-1, keepdims=True)
    e = jnp.exp(x - m)
    # exact divide: decoder output feeds the probability-sum check.
    o_ref[...] = e / jnp.sum(e, axis=-1, keepdims=True)


@jax.jit
def pallas_softmax(x2d):
    M, D = x2d.shape
    Mp, tr = _pick_tile(M, 8, 512)
    xp = x2d if Mp == M else jnp.pad(x2d, ((0, Mp - M), (0, 0)))
    out = pl.pallas_call(
        _softmax_kernel,
        out_shape=jax.ShapeDtypeStruct((Mp, D), F32),
        grid=(Mp // tr,),
        in_specs=[pl.BlockSpec((tr, D), lambda i: (i, 0))],
        out_specs=pl.BlockSpec((tr, D), lambda i: (i, 0)),
        compiler_params=pltpu.CompilerParams(
            dimension_semantics=("parallel",)),
    )(xp)
    return out[:M] if Mp != M else out


def _mean_axis1_kernel(x_ref, o_ref):
    o_ref[...] = jnp.mean(x_ref[...].astype(jnp.float32), axis=1,
                          keepdims=True)


@jax.jit
def pallas_mean_axis1(x3d):
    """(N, L, C) -> (N, C): lane-dense adaptive average pool over L,
    tiled over N with a parallel grid (feeds both TCs on v7x)."""
    N, L, C = x3d.shape
    out = pl.pallas_call(
        _mean_axis1_kernel,
        out_shape=jax.ShapeDtypeStruct((N, 1, C), F32),
        grid=(N,),
        in_specs=[pl.BlockSpec((1, L, C), lambda n: (n, 0, 0))],
        out_specs=pl.BlockSpec((1, 1, C), lambda n: (n, 0, 0)),
        compiler_params=pltpu.CompilerParams(
            dimension_semantics=("parallel",)),
    )(x3d)
    return out.reshape(N, C)


def _attention_kernel(q_ref, k_ref, v_ref, o_ref):
    # 1/sqrt(D) scale is folded into the Q projection weights (prepare step).
    q = q_ref[0]
    k = k_ref[0]
    v = v_ref[0]
    s = jax.lax.dot_general(q, k, (((1,), (1,)), ((), ())),
                            preferred_element_type=jnp.float32)
    m = jnp.max(s, axis=-1, keepdims=True)
    e = jnp.exp(s - m)
    p = e * pl.reciprocal(jnp.sum(e, axis=-1, keepdims=True), approx=True)
    o_ref[0] = jnp.dot(p.astype(v.dtype), v,
                       preferred_element_type=jnp.float32)


@jax.jit
def pallas_attention(q, k, v):
    """Fused scaled-dot-product attention (QK^T, softmax, PV in VMEM),
    one grid step per batch element."""
    B, S, D = q.shape
    return pl.pallas_call(
        _attention_kernel,
        out_shape=jax.ShapeDtypeStruct((B, S, D), F32),
        grid=(B,),
        in_specs=[pl.BlockSpec((1, S, D), lambda b: (b, 0, 0))] * 3,
        out_specs=pl.BlockSpec((1, S, D), lambda b: (b, 0, 0)),
        compiler_params=pltpu.CompilerParams(
            dimension_semantics=("parallel",)),
    )(q, k, v)


def _lstm_step_kernel(gx_ref, whh_ref, out_ref, h_sc, c_sc):
    """One LSTM timestep per grid step.  gx_ref block: (1, B, 4H) bf16
    (x@W_ih + b), whh_ref: (H, 4H) bf16 resident in VMEM, h/c f32 scratch."""
    t = pl.program_id(0)

    @pl.when(t == 0)
    def _():
        h_sc[...] = jnp.zeros_like(h_sc)
        c_sc[...] = jnp.zeros_like(c_sc)

    H = h_sc.shape[-1]
    g = gx_ref[0].astype(jnp.float32) + jnp.dot(
        h_sc[...].astype(whh_ref.dtype), whh_ref[...],
        preferred_element_type=jnp.float32)
    i = jax.nn.sigmoid(g[:, 0:H])
    f = jax.nn.sigmoid(g[:, H:2 * H])
    gg = jnp.tanh(g[:, 2 * H:3 * H])
    o = jax.nn.sigmoid(g[:, 3 * H:4 * H])
    c_new = f * c_sc[...] + i * gg
    h_new = o * jnp.tanh(c_new)
    c_sc[...] = c_new
    h_sc[...] = h_new
    out_ref[0] = h_new.astype(out_ref.dtype)


@jax.jit
def pallas_lstm_seq(gx_tbg, w_hh_bf16):
    """gx_tbg: (T, B, 4H) bf16, w_hh: (H, 4H) bf16 -> (T, B, H) bf16.
    grid=(T,) 'arbitrary' (sequential recurrence); gx tiles auto-pipelined,
    W_hh stays resident (constant index map)."""
    # TODO(synk): pack more independent sequences into B — the per-step
    # (B, H)x(H, 4H) matmul uses only B MXU rows.
    T, B, G4 = gx_tbg.shape
    H = G4 // 4
    return pl.pallas_call(
        _lstm_step_kernel,
        out_shape=jax.ShapeDtypeStruct((T, B, H), BF16),
        grid=(T,),
        in_specs=[pl.BlockSpec((1, B, G4), lambda t: (t, 0, 0)),
                  pl.BlockSpec((H, G4), lambda t: (0, 0))],
        out_specs=pl.BlockSpec((1, B, H), lambda t: (t, 0, 0)),
        scratch_shapes=[pltpu.VMEM((B, H), jnp.float32),
                        pltpu.VMEM((B, H), jnp.float32)],
        compiler_params=pltpu.CompilerParams(
            dimension_semantics=("arbitrary",),
            vmem_limit_bytes=VMEM_LIMIT),
    )(gx_tbg, w_hh_bf16)


# ============================================================================
# Layers built on the kernels (glue: padding / patch extraction / reshapes)
# ============================================================================

def _same_pad(i, k, s):
    return max((math.ceil(i / s) - 1) * s + (k - 1) + 1 - i, 0)


def conv2d_act(x, p, stride, relu=False, residual=None):
    """NHWC conv with TF/Conv2dSame padding.  `p` holds the BN-folded 2D
    weight (bf16) + bias (f32).  bias / residual / ReLU fused in the GEMM
    epilogue; output written back in bf16 (feeds the next conv / pool)."""
    # TODO(synk): fuse patch extraction into the GEMM (Element-indexed LHS
    # BlockSpec or a manual-DMA LHS) so the im2col matrix never hits HBM.
    N, H, W, Cin = x.shape
    KH, KW = p["kh"], p["kw"]
    O = p["w"].shape[1]
    x = x.astype(BF16)
    s = stride
    ph = _same_pad(H, KH, s)
    pw = _same_pad(W, KW, s)
    xp = jnp.pad(x, ((0, 0), (ph // 2, ph - ph // 2),
                     (pw // 2, pw - pw // 2), (0, 0)))
    Hp, Wp = xp.shape[1], xp.shape[2]
    OH = (Hp - KH) // s + 1
    OW = (Wp - KW) // s + 1
    if KH == 1 and KW == 1:
        pat = xp[:, ::s, ::s, :][:, :OH, :OW, :].reshape(N * OH * OW, Cin)
    else:
        patches = [
            xp[:, kh:kh + (OH - 1) * s + 1:s, kw:kw + (OW - 1) * s + 1:s, :]
            for kh in range(KH) for kw in range(KW)]
        pat = jnp.stack(patches, axis=3).reshape(N * OH * OW, KH * KW * Cin)
    res2d = residual.reshape(N * OH * OW, O) if residual is not None else None
    y = pallas_matmul(pat, p["w"], bias=p["b"], residual=res2d, relu=relu,
                      out_dtype=BF16)
    return y.reshape(N, OH, OW, O)


def maxpool2x2(x):
    N, H, W, C = x.shape
    H2, W2 = H // 2, W // 2
    x = x[:, :H2 * 2, :W2 * 2, :]
    return jnp.max(x.reshape(N, H2, 2, W2, 2, C), axis=(2, 4))


def bottleneck_forward(p, x):
    if "ds" in p:
        identity = conv2d_act(x, p["ds"], p["stride"], relu=False)
    else:
        identity = x
    y = conv2d_act(x, p["conv1"], p["stride"], relu=True)
    # conv2 + BN2 + residual add + ReLU fused into one GEMM epilogue.
    y = conv2d_act(y, p["conv2"], 1, relu=True, residual=identity)
    return y


def resnet_forward(p, x_nhwc):
    y = conv2d_act(x_nhwc, p["stem"], 2, relu=True)
    y = maxpool2x2(y)
    for blocks in p["layers"]:
        for blk in blocks:
            y = bottleneck_forward(blk, y)
    N, H, W, C = y.shape
    # AdaptiveAvgPool2d((1,1)) as a lane-dense mean over H*W (C on lanes).
    return pallas_mean_axis1(y.reshape(N, H * W, C))


def linear(p, x, relu=False, out_dtype=F32):
    shp = x.shape
    y = pallas_matmul(x.reshape(-1, shp[-1]), p["w"], bias=p["b"], relu=relu,
                      out_dtype=out_dtype)
    return y.reshape(shp[:-1] + (p["w"].shape[1],))


def lstm_forward_tb(p, x_tbd):
    """Single-layer LSTM, PyTorch gate order i,f,g,o, (T, B, D) layout so the
    input-projection GEMM writes the recurrence layout directly (no
    activation transposes)."""
    T, B, Din = x_tbd.shape
    H = p["W_hh"].shape[0]
    gx = pallas_matmul(x_tbd.reshape(T * B, Din), p["W_ih"], bias=p["b"],
                       out_dtype=BF16).reshape(T, B, 4 * H)
    return pallas_lstm_seq(gx, p["W_hh"])          # (T, B, H) bf16


def cnnlstm_forward(p, x):
    """x: (Bg1, G2, C, H, W) NCHW frames -> (Bg1, 512)."""
    Bg1, G2, C, H, W = x.shape
    frames = jnp.transpose(x.reshape(Bg1 * G2, C, H, W),
                           (0, 2, 3, 1)).astype(BF16)          # NHWC bf16
    feat = resnet_forward(p["resnet"], frames)                 # (Bg1*G2, 512)
    feat_tb = feat.reshape(Bg1, G2, -1).transpose(1, 0, 2)     # (T, B, 512)
    y = lstm_forward_tb(p["lstm1"], feat_tb)   # Dropout: eval -> identity
    y = lstm_forward_tb(p["lstm2"], y)
    return y[-1]                                               # (Bg1, H)


def attention_self(p, x):
    """Self-attention: fused (D, 3D) QKV projection, then fused attention."""
    B, S, D = x.shape
    qkv = pallas_matmul(x.reshape(-1, D), p["wqkv"], bias=p["bqkv"],
                        out_dtype=BF16).reshape(B, S, 3 * D)
    q, k, v = qkv[..., :D], qkv[..., D:2 * D], qkv[..., 2 * D:]
    return pallas_attention(q, k, v)


def attention_cross(p, xq, xkv):
    """Cross-attention: Q from xq, fused (D, 2D) K|V projection from xkv."""
    B, S, D = xq.shape
    q = pallas_matmul(xq.reshape(-1, D), p["wq"], bias=p["bq"],
                      out_dtype=BF16).reshape(B, S, D)
    kv = pallas_matmul(xkv.reshape(-1, D), p["wkv"], bias=p["bkv"],
                       out_dtype=BF16).reshape(B, S, 2 * D)
    return pallas_attention(q, kv[..., :D], kv[..., D:])


def initial_encoder_fwd(p, x1):
    B, S, D = x1.shape
    xw = attention_self(p["att"], x1)
    xw = x1 * p["lambda"] + xw * (1.0 - p["lambda"])
    xw = pallas_layernorm(xw.reshape(-1, D),
                          p["ln1_g"], p["ln1_b"]).reshape(B, S, D)
    fc1 = linear(p["fc1"], xw)
    xw = pallas_layernorm((xw + fc1).reshape(-1, D),
                          p["ln2_g"], p["ln2_b"]).reshape(B, S, D)
    return linear(p["fc2"], xw)


def second_encoder_fwd(p, x1, x2):
    B, S, D = x1.shape
    w1 = attention_self(p["att1"], x1)
    w2 = attention_cross(p["att2"], x1, x2)
    w12 = w1 * p["lambda"] + w2 * (1.0 - p["lambda"])
    w12 = pallas_layernorm((x1 + w12).reshape(-1, D),
                           p["ln1_g"], p["ln1_b"]).reshape(B, S, D)
    fc1 = linear(p["fc1"], w12)
    w12 = pallas_layernorm((w12 + fc1).reshape(-1, D),
                           p["ln2_g"], p["ln2_b"]).reshape(B, S, D)
    return linear(p["fc2"], w12)


def decoder_forward(p, x):
    # transpose + AdaptiveAvgPool1d(1) + reshape == lane-dense mean over S.
    pooled = pallas_mean_axis1(x)                                # (B, D)
    h = pallas_matmul(pooled, p["fc1"]["w"], bias=p["fc1"]["b"], relu=True)
    y = pallas_matmul(h, p["fc2"]["w"], bias=p["fc2"]["b"])
    return pallas_softmax(y)


def transformer_forward(p, x):
    x_w = [x, initial_encoder_fwd(p["encoders"][0], x)]
    for ep in p["encoders"][1:]:
        x_w.append(second_encoder_fwd(ep, x, x_w[-1]))
    ys = [decoder_forward(dp, x_w[i]) for i, dp in enumerate(p["decoders"])]
    return jnp.mean(jnp.stack(ys, axis=0), axis=0)


def avmodel_forward(p, audio, video):
    B, Ga, Ca, Na, La = audio.shape
    a = jnp.transpose(audio.reshape(B * Ga, Ca, Na, La),
                      (0, 2, 3, 1)).astype(BF16)                     # NHWC
    a_feat = resnet_forward(p["feature_audio"], a).reshape(B, Ga, -1)
    a_n = linear(p["fc_audio"], jnp.transpose(a_feat, (0, 2, 1)))
    a_n = jnp.transpose(a_n, (0, 2, 1))                              # (B,h_f,512)

    Bv, G1, G2, Cv, Hv, Wv = video.shape
    v = video.reshape(B * G1, G2, Cv, Hv, Wv)
    v_feat = cnnlstm_forward(p["feature_video"], v).reshape(B, G1, -1)
    v_n = linear(p["fc_video"], jnp.transpose(v_feat, (0, 2, 1)))
    v_n = jnp.transpose(v_n, (0, 2, 1))                              # (B,h_f,512)

    av = jnp.concatenate([a_n, v_n], axis=1)                         # (B,2*h_f,512)
    return transformer_forward(p["fusion"], av)


# ============================================================================
# Deterministic parameter initialization (matching PyTorch module shapes)
# ============================================================================

class KeyGen:
    def __init__(self, key):
        self.key = key

    def __call__(self):
        self.key, sub = jax.random.split(self.key)
        return sub


def init_linear(kg, din, dout):
    s = 1.0 / math.sqrt(din)
    return {"w": jax.random.uniform(kg(), (din, dout), F32, -s, s),
            "b": jax.random.uniform(kg(), (dout,), F32, -s, s)}


def init_conv(kg, kh, kw, cin, cout, bias=True):
    s = 1.0 / math.sqrt(kh * kw * cin)
    w = jax.random.uniform(kg(), (kh, kw, cin, cout), F32, -s, s)
    b = jax.random.uniform(kg(), (cout,), F32, -s, s) if bias else None
    return {"w": w, "b": b}


def init_bn(c):
    return {"gamma": jnp.ones((c,), F32), "beta": jnp.zeros((c,), F32),
            "mean": jnp.zeros((c,), F32), "var": jnp.ones((c,), F32)}


def init_resnet(kg, in_channels):
    p = {"stem_conv": init_conv(kg, 7, 7, in_channels, 64, bias=False),
         "stem_bn": init_bn(64)}
    in_c = 64
    layers = []
    for planes, stride in [(64, 1), (128, 2), (256, 2), (512, 2)]:
        blocks = []
        for bi in range(2):
            s = stride if bi == 0 else 1
            blk = {"stride": s,
                   "conv1": init_conv(kg, 3, 3, in_c, planes, bias=True),
                   "bn1": init_bn(planes),
                   "conv2": init_conv(kg, 3, 3, planes, planes, bias=True),
                   "bn2": init_bn(planes)}
            if bi == 0 and (s != 1 or in_c != planes):
                blk["ds_conv"] = init_conv(kg, 1, 1, in_c, planes, bias=True)
                blk["ds_bn"] = init_bn(planes)
            blocks.append(blk)
            in_c = planes
        layers.append(blocks)
    p["layers"] = layers
    return p


def init_lstm(kg, din, h):
    s = 1.0 / math.sqrt(h)
    return {"W_ih": jax.random.uniform(kg(), (din, 4 * h), F32, -s, s),
            "W_hh": jax.random.uniform(kg(), (h, 4 * h), F32, -s, s),
            "b_ih": jax.random.uniform(kg(), (4 * h,), F32, -s, s),
            "b_hh": jax.random.uniform(kg(), (4 * h,), F32, -s, s)}


def init_attention(kg, d):
    return {"q": init_linear(kg, d, d), "k": init_linear(kg, d, d),
            "v": init_linear(kg, d, d)}


def init_initial_encoder(kg, d):
    return {"att": init_attention(kg, d), "lambda": jnp.asarray(1.0, F32),
            "ln1_g": jnp.ones((d,), F32), "ln1_b": jnp.zeros((d,), F32),
            "ln2_g": jnp.ones((d,), F32), "ln2_b": jnp.zeros((d,), F32),
            "fc1": init_linear(kg, d, d), "fc2": init_linear(kg, d, d)}


def init_second_encoder(kg, d):
    return {"att1": init_attention(kg, d), "att2": init_attention(kg, d),
            "lambda": jnp.asarray(1.0, F32),
            "ln1_g": jnp.ones((d,), F32), "ln1_b": jnp.zeros((d,), F32),
            "ln2_g": jnp.ones((d,), F32), "ln2_b": jnp.zeros((d,), F32),
            "fc1": init_linear(kg, d, d), "fc2": init_linear(kg, d, d)}


def init_decoder(kg, input_dim, h_u, n_class):
    return {"fc1": init_linear(kg, input_dim, h_u),
            "fc2": init_linear(kg, h_u, n_class)}


def init_transformer(kg, input_dim, h_u, n_class, encoder_decoder):
    encoders = [init_initial_encoder(kg, input_dim)]
    for _ in range(encoder_decoder - 1):
        encoders.append(init_second_encoder(kg, input_dim))
    decoders = [init_decoder(kg, input_dim, h_u, n_class)
                for _ in range(encoder_decoder)]
    return {"encoders": encoders, "decoders": decoders}


def init_avmodel(key, shape_audio, shape_video, input_dim=512, h_u=512,
                 h_f=64, n_class=500, encoder_decoder=5):
    kg = KeyGen(key)
    return {
        "feature_audio": init_resnet(kg, shape_audio[2]),
        "fc_audio": init_linear(kg, shape_audio[1], h_f),
        "feature_video": {"resnet": init_resnet(kg, 3),
                          "lstm1": init_lstm(kg, h_u, h_u),
                          "lstm2": init_lstm(kg, h_u, h_u)},
        "fc_video": init_linear(kg, shape_video[1], h_f),
        "fusion": init_transformer(kg, input_dim, h_u, n_class, encoder_decoder),
        "input_dim": input_dim,
    }


# ============================================================================
# One-time inference preparation: BN folding, weight reshape/cast, fused QKV
# ============================================================================

def prepare_conv_bn(conv, bn):
    w, b = conv["w"], conv["b"]
    KH, KW, Cin, O = w.shape
    if bn is not None:
        eps = 1e-3   # matches nn.BatchNorm2d(..., eps=0.001)
        scale = bn["gamma"] / jnp.sqrt(bn["var"] + eps)
        shift = bn["beta"] - bn["mean"] * scale
        w = w * scale
        b = shift + (b * scale if b is not None else 0.0)
    elif b is None:
        b = jnp.zeros((O,), F32)
    return {"w": w.reshape(KH * KW * Cin, O).astype(BF16),
            "b": b.astype(F32), "kh": KH, "kw": KW}


def prepare_resnet(p):
    out = {"stem": prepare_conv_bn(p["stem_conv"], p["stem_bn"]), "layers": []}
    for blocks in p["layers"]:
        new_blocks = []
        for blk in blocks:
            nb = {"stride": blk["stride"],
                  "conv1": prepare_conv_bn(blk["conv1"], blk["bn1"]),
                  "conv2": prepare_conv_bn(blk["conv2"], blk["bn2"])}
            if "ds_conv" in blk:
                nb["ds"] = prepare_conv_bn(blk["ds_conv"], blk["ds_bn"])
            new_blocks.append(nb)
        out["layers"].append(new_blocks)
    return out


def prepare_linear(p):
    return {"w": p["w"].astype(BF16), "b": p["b"].astype(F32)}


def prepare_lstm(p):
    return {"W_ih": p["W_ih"].astype(BF16), "W_hh": p["W_hh"].astype(BF16),
            "b": (p["b_ih"] + p["b_hh"]).astype(F32)}


def prepare_attention(p, d):
    scale = 1.0 / math.sqrt(d)           # fold 1/sqrt(D) into the Q projection
    wq, bq = p["q"]["w"] * scale, p["q"]["b"] * scale
    wk, bk = p["k"]["w"], p["k"]["b"]
    wv, bv = p["v"]["w"], p["v"]["b"]
    return {"wqkv": jnp.concatenate([wq, wk, wv], axis=1).astype(BF16),
            "bqkv": jnp.concatenate([bq, bk, bv], axis=0).astype(F32),
            "wq": wq.astype(BF16), "bq": bq.astype(F32),
            "wkv": jnp.concatenate([wk, wv], axis=1).astype(BF16),
            "bkv": jnp.concatenate([bk, bv], axis=0).astype(F32)}


def prepare_encoder(p, d):
    out = {"lambda": p["lambda"],
           "ln1_g": p["ln1_g"], "ln1_b": p["ln1_b"],
           "ln2_g": p["ln2_g"], "ln2_b": p["ln2_b"],
           "fc1": prepare_linear(p["fc1"]), "fc2": prepare_linear(p["fc2"])}
    if "att" in p:
        out["att"] = prepare_attention(p["att"], d)
    else:
        out["att1"] = prepare_attention(p["att1"], d)
        out["att2"] = prepare_attention(p["att2"], d)
    return out


def prepare_transformer(p, d):
    return {"encoders": [prepare_encoder(e, d) for e in p["encoders"]],
            "decoders": [{"fc1": prepare_linear(dd["fc1"]),
                          "fc2": prepare_linear(dd["fc2"])}
                         for dd in p["decoders"]]}


def prepare_avmodel(p):
    d = p["input_dim"]
    return {
        "feature_audio": prepare_resnet(p["feature_audio"]),
        "fc_audio": prepare_linear(p["fc_audio"]),
        "feature_video": {"resnet": prepare_resnet(p["feature_video"]["resnet"]),
                          "lstm1": prepare_lstm(p["feature_video"]["lstm1"]),
                          "lstm2": prepare_lstm(p["feature_video"]["lstm2"])},
        "fc_video": prepare_linear(p["fc_video"]),
        "fusion": prepare_transformer(p["fusion"], d),
    }


# ============================================================================
if __name__ == "__main__":
    key = jax.random.PRNGKey(0)
    k1, k2, k3 = jax.random.split(key, 3)

    # Small shapes: B=1, audio groups Ga=2 (1 channel, 16x16 spectrogram),
    # video groups G1=2 with G2=2 RGB frames of 16x16.
    audio = jax.random.normal(k1, (1, 2, 1, 16, 16), F32)
    video = jax.random.normal(k2, (1, 2, 2, 3, 16, 16), F32)

    raw_params = init_avmodel(k3, audio.shape, video.shape,
                              input_dim=512, h_u=512, h_f=8,
                              n_class=16, encoder_decoder=2)
    params = prepare_avmodel(raw_params)   # BN fold / bf16 / fused QKV, once

    out = avmodel_forward(params, audio, video)
    out = jax.block_until_ready(out)

    assert out.shape == (1, 16)
    assert abs(float(jnp.sum(out)) - 1.0) < 1e-3  # mean of softmaxes sums to 1
    assert bool(jnp.all(jnp.isfinite(out)))
    print("KERNEL_OK")
</pallas_src>

<mosaic_0001>
module attributes {stable_mosaic.version = 11 : i64} {
  func.func @_mm_kernel(%arg0: i32, %arg1: i32, %arg2: i32, %arg3: memref<128x128xbf16, #tpu.memory_space<vmem>>, %arg4: memref<128x128xbf16, #tpu.memory_space<vmem>>, %arg5: memref<1x128xf32, #tpu.memory_space<vmem>>, %arg6: memref<128x128xbf16, #tpu.memory_space<vmem>>, %arg7: memref<128x128xf32, #tpu.memory_space<vmem>>) attributes {dimension_semantics = [#tpu.dimension_semantics<parallel>, #tpu.dimension_semantics<parallel>, #tpu.dimension_semantics<arbitrary>], iteration_bounds = array<i64: 1, 1, 1>, scalar_prefetch = 0 : i64, scratch_operands = 1 : i64, tpu.core_type = #tpu.core_type<tc>, window_params = [{transform_indices = @transform_0, window_bounds = array<i64: 128, 128>}, {transform_indices = @transform_1, window_bounds = array<i64: 128, 128>}, {transform_indices = @transform_2, window_bounds = array<i64: 1, 128>}, {transform_indices = @transform_3, window_bounds = array<i64: 128, 128>}]} {
    %c0_i32 = arith.constant 0 : i32
    %0 = arith.cmpi eq, %arg2, %c0_i32 : i32
    %1 = arith.extui %0 : i1 to i32
    %c0_i32_0 = arith.constant 0 : i32
    %2 = arith.cmpi ne, %1, %c0_i32_0 : i32
    scf.if %2 {
      %cst_10 = arith.constant 0.000000e+00 : f32
      %12 = vector.broadcast %cst_10 : f32 to vector<128x128xf32>
      %c0_11 = arith.constant 0 : index
      %c0_12 = arith.constant 0 : index
      %13 = vector.load %arg7[%c0_11, %c0_12] : memref<128x128xf32, #tpu.memory_space<vmem>>, vector<128x128xf32>
      tpu.vector_store %arg7[%c0_11, %c0_12], %12 {strides = array<i32>} : memref<128x128xf32, #tpu.memory_space<vmem>>, vector<128x128xf32>,
    } else {
    }
    %c0 = arith.constant 0 : index
    %c0_1 = arith.constant 0 : index
    %3 = vector.load %arg7[%c0, %c0_1] : memref<128x128xf32, #tpu.memory_space<vmem>>, vector<128x128xf32>
    %c0_2 = arith.constant 0 : index
    %c0_3 = arith.constant 0 : index
    %4 = vector.load %arg3[%c0_2, %c0_3] : memref<128x128xbf16, #tpu.memory_space<vmem>>, vector<128x128xbf16>
    %c0_4 = arith.constant 0 : index
    %c0_5 = arith.constant 0 : index
    %5 = vector.load %arg4[%c0_4, %c0_5] : memref<128x128xbf16, #tpu.memory_space<vmem>>, vector<128x128xbf16>
    %cst = arith.constant dense<0.000000e+00> : vector<128x128xf32>
    %6 = tpu.matmul %4, %5, %cst {dimension_numbers = #tpu.dot_dimension_numbers<[1], [0], [0], [1], [0, 0, 1, 1], [], []>} : vector<128x128xbf16>, vector<128x128xbf16>, vector<128x128xf32> -> vector<128x128xf32>
    %7 = arith.addf %3, %6 : vector<128x128xf32>
    %c0_6 = arith.constant 0 : index
    %c0_7 = arith.constant 0 : index
    %8 = vector.load %arg7[%c0_6, %c0_7] : memref<128x128xf32, #tpu.memory_space<vmem>>, vector<128x128xf32>
    tpu.vector_store %arg7[%c0_6, %c0_7], %7 {strides = array<i32>} : memref<128x128xf32, #tpu.memory_space<vmem>>, vector<128x128xf32>,
    %c0_i32_8 = arith.constant 0 : i32
    %9 = arith.cmpi eq, %arg2, %c0_i32_8 : i32
    %10 = arith.extui %9 : i1 to i32
    %c0_i32_9 = arith.constant 0 : i32
    %11 = arith.cmpi ne, %10, %c0_i32_9 : i32
    scf.if %11 {
      %c0_10 = arith.constant 0 : index
      %c0_11 = arith.constant 0 : index
      %12 = vector.load %arg7[%c0_10, %c0_11] : memref<128x128xf32, #tpu.memory_space<vmem>>, vector<128x128xf32>
      %c0_12 = arith.constant 0 : index
      %c0_13 = arith.constant 0 : index
      %13 = vector.load %arg5[%c0_12, %c0_13] : memref<1x128xf32, #tpu.memory_space<vmem>>, vector<1x128xf32>
      %14 = vector.broadcast %13 : vector<1x128xf32> to vector<128x128xf32>
      %15 = arith.addf %12, %14 : vector<128x128xf32>
      %cst_14 = arith.constant 0.000000e+00 : f32
      %16 = vector.broadcast %cst_14 : f32 to vector<128x128xf32>
      %17 = arith.maximumf %15, %16 : vector<128x128xf32>
      %18 = arith.truncf %17 : vector<128x128xf32> to vector<128x128xbf16>
      %c0_15 = arith.constant 0 : index
      %c0_16 = arith.constant 0 : index
      %19 = vector.load %arg6[%c0_15, %c0_16] : memref<128x128xbf16, #tpu.memory_space<vmem>>, vector<128x128xbf16>
      tpu.vector_store %arg6[%c0_15, %c0_16], %18 {strides = array<i32>} : memref<128x128xbf16, #tpu.memory_space<vmem>>, vector<128x128xbf16>,
    } else {
    }
    return
  }
  func.func @transform_0(%arg0: i32, %arg1: i32, %arg2: i32) -> (i32, i32) {
    %c0_i32 = arith.constant 0 : i32
    return %arg0, %arg2 : i32, i32
  }
  func.func @transform_1(%arg0: i32, %arg1: i32, %arg2: i32) -> (i32, i32) {
    %c0_i32 = arith.constant 0 : i32
    return %arg2, %arg1 : i32, i32
  }
  func.func @transform_2(%arg0: i32, %arg1: i32, %arg2: i32) -> (i32, i32) {
    %c0_i32 = arith.constant 0 : i32
    %c0_i32_0 = arith.constant 0 : i32
    return %c0_i32, %arg1 : i32, i32
  }
  func.func @transform_3(%arg0: i32, %arg1: i32, %arg2: i32) -> (i32, i32) {
    %c0_i32 = arith.constant 0 : i32
    return %arg0, %arg1 : i32, i32
  }
}

</mosaic_0001>

<bundles_post_ra>
// kernel: pallas_matmul.1
= control target key start
LH: loop header
LB: loop body
LE: loop exit
PB: predicated region body
PF: predicated region fallthrough
CT: control target
= control target key end

     0   :  { %s721_s1 = inlined_call_operand.vmem [shape: bf16[128,128], index: 1, kind: input, shape index: {}]   ;;  %s722_s0 = inlined_call_operand.vmem [shape: bf16[128,128], index: 0, kind: input, shape index: {}]   ;;  %s723_s2 = inlined_call_operand.vmem [shape: f32[1,128], index: 2, kind: input, shape index: {}]   ;;  %s724_s3 = inlined_call_operand.vmem [shape: bf16[128,128], index: 3, kind: output, shape index: {}]  }
   0x1   :  { %v610_v0 = vld [vmem:[%s721_s1 + $0x38] sm:$0xff]   ;;  %v611_v1 = vld [vmem:[%s721_s1 + $0x30] sm:$0xff]   ;;  %v612_v2 = vld [vmem:[%s721_s1 + $0x28] sm:$0xff]  }
   0x2   :  { %562 = vmatprep.subr.bf16.mxu0 %v610_v0  ;;  %594 = vmatprep.subr.bf16.mxu1 %v610_v0  ;;  %v613_v3 = vld [vmem:[%s721_s1 + $0x20] sm:$0xff]   ;;  %v614_v6 = vld [vmem:[%s721_s1 + $0x18] sm:$0xff]   ;;  %v615_v7 = vld [vmem:[%s721_s1 + $0x10] sm:$0xff]  }
   0x3   :  { %563 = vmatpush3.bf16.msra.mxu0 %v610_v0  ;;  %602 = vmatpush3.bf16.msra.mxu1 %v610_v0  ;;  %v618_v4 = vld [vmem:[%s722_s0] sm:$0xff]   ;;  %v616_v8 = vld [vmem:[%s721_s1 + $0x8] sm:$0xff]   ;;  %v622_v12 = vld [vmem:[%s722_s0 + $0x10] sm:$0xff]  }
   0x4   :  { %564 = vmatprep.subr.bf16.mxu0 %v611_v1  ;;  %595 = vmatprep.subr.bf16.mxu1 %v611_v1  ;;  %v619_v5 = vld [vmem:[%s722_s0 + $0x20] sm:$0xff]   ;;  %v620_v10 = vld [vmem:[%s722_s0 + $0x8] sm:$0xff]   ;;  %v623_v13 = vld [vmem:[%s722_s0 + $0x30] sm:$0xff]  }
   0x5   :  { %578 = vmatprep.mubr.bf16.mxu0 %v618_v4  ;;  %586 = vmatprep.mubr.bf16.mxu1 %v619_v5  ;;  %v617_v9 = vld [vmem:[%s721_s1] sm:$0xff]   ;;  %v621_v11 = vld [vmem:[%s722_s0 + $0x28] sm:$0xff]   ;;  %v624_v14 = vld [vmem:[%s722_s0 + $0x18] sm:$0xff]  }
   0x6   :  { %v625_v15 = vld [vmem:[%s722_s0 + $0x38] sm:$0xff]   ;;  %v466_v16 = vld [vmem:[%s723_s2] ss:$0 sm:$0xff] }
   0x7   :  { %565 = vmatpush3.bf16.msra.mxu0 %v611_v1  ;;  %603 = vmatpush3.bf16.msra.mxu1 %v611_v1 }
   0x8   :  { %566 = vmatprep.subr.bf16.mxu0 %v612_v2  ;;  %596 = vmatprep.subr.bf16.mxu1 %v612_v2 }
   0xb   :  { %567 = vmatpush3.bf16.msra.mxu0 %v612_v2  ;;  %604 = vmatpush3.bf16.msra.mxu1 %v612_v2 }
   0xc   :  { %568 = vmatprep.subr.bf16.mxu0 %v613_v3  ;;  %597 = vmatprep.subr.bf16.mxu1 %v613_v3 }
   0xf   :  { %569 = vmatpush3.bf16.msra.mxu0 %v613_v3  ;;  %605 = vmatpush3.bf16.msra.mxu1 %v613_v3 }
  0x10   :  { %570 = vmatprep.subr.bf16.mxu0 %v614_v6  ;;  %598 = vmatprep.subr.bf16.mxu1 %v614_v6 }
  0x13   :  { %571 = vmatpush3.bf16.msra.mxu0 %v614_v6  ;;  %606 = vmatpush3.bf16.msra.mxu1 %v614_v6 }
  0x14   :  { %572 = vmatprep.subr.bf16.mxu0 %v615_v7  ;;  %599 = vmatprep.subr.bf16.mxu1 %v615_v7 }
  0x17   :  { %573 = vmatpush3.bf16.msra.mxu0 %v615_v7  ;;  %607 = vmatpush3.bf16.msra.mxu1 %v615_v7 }
  0x18   :  { %574 = vmatprep.subr.bf16.mxu0 %v616_v8  ;;  %600 = vmatprep.subr.bf16.mxu1 %v616_v8 }
  0x1b   :  { %575 = vmatpush3.bf16.msra.mxu0 %v616_v8  ;;  %608 = vmatpush3.bf16.msra.mxu1 %v616_v8 }
  0x1c   :  { %576 = vmatprep.subr.bf16.mxu0 %v617_v9  ;;  %601 = vmatprep.subr.bf16.mxu1 %v617_v9 }
  0x1f   :  { %577 = vmatpush3.bf16.msra.mxu0 %v617_v9  ;;  %609 = vmatpush3.bf16.msra.mxu1 %v617_v9 }
  0x22   :  { %579 = vmatmul.mubr.bf16.vlgmr.msra.gmra.mxu0 %v620_v10  ;;  %587 = vmatmul.mubr.bf16.vlgmr.msra.gmra.mxu1 %v621_v11 }
  0x23   :  { %582 = vmatprep.mubr.bf16.mxu0 %v622_v12  ;;  %590 = vmatprep.mubr.bf16.mxu1 %v623_v13 }
  0x2a   :  { %583 = vmatmul.mubr.bf16.gmra.mxu0 %v624_v14  ;;  %591 = vmatmul.mubr.bf16.gmra.mxu1 %v625_v15 }
  0xe2   :  { %v580_v17 = vpop.f32.mrf.mxu0  ;;  %v588_v18 = vpop.f32.mrf.mxu1 }
  0xe3   :  { %v336_v19 = vadd.f32 %v580_v17, %v466_v16  ;;  %v344_v20 = vadd.f32 %v588_v18, %v466_v16 }
  0xe4   :  { %v213_v21 = vpop.f32.mrf.mxu0  ;;  %v245_v22 = vpop.f32.mrf.mxu1 }
  0xe5   :  { %v334_v23 = vadd.f32 %v466_v16, %v213_v21  ;;  %v342_v24 = vadd.f32 %v466_v16, %v245_v22  ;;  %v352_v29 = vmax.f32 %v336_v19, 0.0  ;;  %v360_v30 = vmax.f32 %v344_v20, 0.0 }
  0xe6   :  { %v581_v25 = vpop.f32.mrf.mxu0  ;;  %v589_v26 = vpop.f32.mrf.mxu1 }
  0xe7   :  { %v337_v27 = vadd.f32 %v581_v25, %v466_v16  ;;  %v345_v28 = vadd.f32 %v589_v26, %v466_v16  ;;  %v350_v37 = vmax.f32 %v334_v23, 0.0  ;;  %v358_v38 = vmax.f32 %v342_v24, 0.0 }
  0xe8   :  { %v216_v31 = vpop.f32.mrf.mxu0  ;;  %v248_v32 = vpop.f32.mrf.mxu1 }
  0xe9   :  { %v353_v33 = vmax.f32 %v337_v27, 0.0  ;;  %v361_v34 = vmax.f32 %v345_v28, 0.0  ;;  %v335_v35 = vadd.f32 %v466_v16, %v216_v31  ;;  %v343_v36 = vadd.f32 %v466_v16, %v248_v32 }
  0xea   :  { %v584_v39 = vpop.f32.mrf.mxu0  ;;  %v592_v40 = vpop.f32.mrf.mxu1 }
  0xeb   :  { %v507_v41 = vpack.c.bf16 %v353_v33, %v352_v29  ;;  %v527_v42 = vpack.c.bf16 %v361_v34, %v360_v30  ;;  %v351_v43 = vmax.f32 %v335_v35, 0.0  ;;  %v359_v44 = vmax.f32 %v343_v36, 0.0 }
  0xec   :  { %v340_v45 = vadd.f32 %v584_v39, %v466_v16  ;;  %v348_v46 = vadd.f32 %v592_v40, %v466_v16  ;;  %v229_v47 = vpop.f32.mrf.mxu0  ;;  %v261_v48 = vpop.f32.mrf.mxu1 }
  0xed   :  { %539 = vst [vmem:[%s724_s3 + $0x8] sm:$0xff] %v507_v41   ;;  %543 = vst [vmem:[%s724_s3 + $0x28] sm:$0xff] %v527_v42   ;;  %v502_v49 = vpack.c.bf16 %v351_v43, %v350_v37  ;;  %v522_v50 = vpack.c.bf16 %v359_v44, %v358_v38  ;;  %v338_v51 = vadd.f32 %v466_v16, %v229_v47 }
  0xee   :  { %v346_v52 = vadd.f32 %v466_v16, %v261_v48  ;;  %v585_v53 = vpop.f32.mrf.mxu0  ;;  %v593_v54 = vpop.f32.mrf.mxu1  ;;  %v356_v57 = vmax.f32 %v340_v45, 0.0  ;;  %v364_v58 = vmax.f32 %v348_v46, 0.0 }
  0xef   :  { %503 = vst [vmem:[%s724_s3] sm:$0xff] %v502_v49   ;;  %542 = vst [vmem:[%s724_s3 + $0x20] sm:$0xff] %v522_v50   ;;  %v341_v55 = vadd.f32 %v585_v53, %v466_v16  ;;  %v349_v56 = vadd.f32 %v593_v54, %v466_v16  ;;  %v354_v1 = vmax.f32 %v338_v51, 0.0 }
  0xf0   :  { %v232_v59 = vpop.f32.mrf.mxu0  ;;  %v264_v60 = vpop.f32.mrf.mxu1  ;;  %v362_v2 = vmax.f32 %v346_v52, 0.0 }
  0xf1   :  { %v357_v61 = vmax.f32 %v341_v55, 0.0  ;;  %v365_v62 = vmax.f32 %v349_v56, 0.0  ;;  %v339_v63 = vadd.f32 %v466_v16, %v232_v59  ;;  %v347_v0 = vadd.f32 %v466_v16, %v264_v60 }
  0xf3   :  { %v517_v3 = vpack.c.bf16 %v357_v61, %v356_v57  ;;  %v537_v4 = vpack.c.bf16 %v365_v62, %v364_v58  ;;  %v355_v5 = vmax.f32 %v339_v63, 0.0  ;;  %v363_v6 = vmax.f32 %v347_v0, 0.0 }
  0xf5   :  { %541 = vst [vmem:[%s724_s3 + $0x18] sm:$0xff] %v517_v3   ;;  %545 = vst [vmem:[%s724_s3 + $0x38] sm:$0xff] %v537_v4   ;;  %v512_v7 = vpack.c.bf16 %v355_v5, %v354_v1  ;;  %v532_v8 = vpack.c.bf16 %v363_v6, %v362_v2 }
  0xf7   :  { %540 = vst [vmem:[%s724_s3 + $0x10] sm:$0xff] %v512_v7   ;;  %544 = vst [vmem:[%s724_s3 + $0x30] sm:$0xff] %v532_v8  }

</bundles_post_ra>
